<compile_context>
chip_gen: v7x
topology: tpu7x:2x2x1
jax: 0.10.0
libtpu: 0.0.40
codegen_flags: <defaults>
</compile_context>

<pallas_src>
import jax
import jax.numpy as jnp
from jax import lax
from jax.experimental import pallas as pl
from jax.experimental.pallas import tpu as pltpu


def _leaky_relu(x, slope=0.2):
    return jnp.where(x > 0, x, slope * x)


def _round_up(x, m):
    return ((x + m - 1) // m) * m


def disc_kernel(xd_ref, xl_ref, w1d_ref, w1l_ref, b1_ref, w2_ref, b2_ref,
                w3_ref, b3_ref, o_ref):
    # Layer 1: Linear(Din, 256) without materializing concat(data, labels):
    #   h1 = data @ W1[:Dd] + labels @ W1[Dd:] + b1   (bf16 MXU, f32 accumulate)
    h1 = jnp.dot(xd_ref[...], w1d_ref[...], preferred_element_type=jnp.float32)
    h1 = h1 + jnp.dot(xl_ref[...], w1l_ref[...],
                      preferred_element_type=jnp.float32)
    h1 = _leaky_relu(h1 + b1_ref[...])          # f32 VPU  (Dropout = identity)

    # Layer 2: Linear(256, 128) + LeakyReLU(0.2)       (Dropout = identity)
    h2 = jnp.dot(h1.astype(jnp.bfloat16), w2_ref[...],
                 preferred_element_type=jnp.float32) + b2_ref[...]
    h2 = _leaky_relu(h2)

    # Layer 3: Linear(128, 1) + Sigmoid.  Contract w3_row (1, H2) with
    # h2 (tile_b, H2) on the last axis -> (1, tile_b): the batch dimension
    # lands on the lane axis, so the final store is a dense (unmasked) vst.
    h3 = lax.dot_general(w3_ref[...], h2.astype(jnp.bfloat16),
                         (((1,), (1,)), ((), ())),
                         preferred_element_type=jnp.float32) + b3_ref[...]
    p = pl.reciprocal(1.0 + jnp.exp(-h3), approx=True)   # sigmoid (EUP recip)
    o_ref[...] = p.reshape(o_ref.shape)


def discriminator_forward(data, labels, params, *, tile_b=512):
    """data: (B, output_dim), labels: (B, num_classes) -> (B, 1) probabilities."""
    w1, b1, w2, b2, w3, b3 = params
    B, Dd = data.shape
    Dl = labels.shape[1]
    H1, H2 = w1.shape[1], w2.shape[1]

    # Large batch tile (MXU-friendly, multiple of 128); pad ragged batches.
    tile_b = min(tile_b, _round_up(B, 128))
    B_pad = _round_up(B, tile_b)
    if B_pad != B:
        data = jnp.pad(data, ((0, B_pad - B), (0, 0)))
        labels = jnp.pad(labels, ((0, B_pad - B), (0, 0)))
    num_tiles = B_pad // tile_b

    # Split W1 once at trace time (removes the concat) and cast matmul
    # operands to bf16; biases stay f32 (added after the f32 accumulation).
    data_b = data.astype(jnp.bfloat16)
    labels_b = labels.astype(jnp.bfloat16)
    w1d = w1[:Dd].astype(jnp.bfloat16)            # (Dd, H1)
    w1l = w1[Dd:].astype(jnp.bfloat16)            # (Dl, H1)
    w2b = w2.astype(jnp.bfloat16)                 # (H1, H2)
    w3r = w3.reshape(1, H2).astype(jnp.bfloat16)  # (1, H2) row form
    b1r = b1.reshape(1, H1).astype(jnp.float32)
    b2r = b2.reshape(1, H2).astype(jnp.float32)
    b3r = b3.reshape(1, 1).astype(jnp.float32)

    full = lambda shape: pl.BlockSpec(shape, lambda i, _n=len(shape): (0,) * _n)

    out = pl.pallas_call(
        disc_kernel,
        out_shape=jax.ShapeDtypeStruct((num_tiles, 1, tile_b), jnp.float32),
        grid=(num_tiles,),
        in_specs=[
            pl.BlockSpec((tile_b, Dd), lambda i: (i, 0)),   # data tile
            pl.BlockSpec((tile_b, Dl), lambda i: (i, 0)),   # labels tile
            full((Dd, H1)), full((Dl, H1)), full((1, H1)),  # W1 (split), b1
            full((H1, H2)), full((1, H2)),                  # W2, b2
            full((1, H2)), full((1, 1)),                    # W3 (row), b3
        ],
        out_specs=pl.BlockSpec((1, 1, tile_b), lambda i: (i, 0, 0)),
        compiler_params=pltpu.CompilerParams(
            dimension_semantics=("parallel",)),
    )(data_b, labels_b, w1d, w1l, b1r, w2b, b2r, w3r, b3r)

    # (num_tiles, 1, tile_b) -> (B_pad, 1), drop padding rows.
    return out.reshape(B_pad, 1)[:B]


def init_params(key, output_dim, num_classes):
    """Deterministic init mirroring nn.Linear's default U(-1/sqrt(fan_in), 1/sqrt(fan_in))."""
    din = output_dim + num_classes
    dims = [(din, 256), (256, 128), (128, 1)]
    params = []
    for (fan_in, fan_out) in dims:
        key, kw, kb = jax.random.split(key, 3)
        bound = 1.0 / jnp.sqrt(fan_in)
        w = jax.random.uniform(kw, (fan_in, fan_out), jnp.float32, -bound, bound)
        b = jax.random.uniform(kb, (1, fan_out), jnp.float32, -bound, bound)
        params += [w, b]
    return tuple(params)


def reference_forward(data, labels, params):
    """Plain-JAX f32 reference (eval-mode dropout) for a correctness check."""
    w1, b1, w2, b2, w3, b3 = params
    x = jnp.concatenate((data, labels), axis=-1)
    h = _leaky_relu(x @ w1 + b1)
    h = _leaky_relu(h @ w2 + b2)
    return jax.nn.sigmoid(h @ w3 + b3)


if __name__ == "__main__":
    key = jax.random.PRNGKey(0)
    batch, output_dim, num_classes = 8, 16, 4

    kp, kd, kl = jax.random.split(key, 3)
    params = init_params(kp, output_dim, num_classes)
    data = jax.random.normal(kd, (batch, output_dim), jnp.float32)
    # one-hot "labels" conditioning vector, like a cGAN discriminator input
    label_ids = jax.random.randint(kl, (batch,), 0, num_classes)
    labels = jax.nn.one_hot(label_ids, num_classes, dtype=jnp.float32)

    out = discriminator_forward(data, labels, params)
    out = jax.block_until_ready(out)

    ref = reference_forward(data, labels, params)
    assert out.shape == (batch, 1)
    # bf16 matmul operands -> allow ~1e-2 deviation from the f32 reference.
    assert jnp.allclose(out, ref, atol=3e-2, rtol=3e-2), "mismatch vs JAX reference"

    print("KERNEL_OK")
</pallas_src>

<mosaic_0001>
module attributes {stable_mosaic.version = 11 : i64} {
  func.func @disc_kernel(%arg0: i32, %arg1: memref<128x16xbf16, #tpu.memory_space<vmem>>, %arg2: memref<128x4xbf16, #tpu.memory_space<vmem>>, %arg3: memref<16x256xbf16, #tpu.memory_space<vmem>>, %arg4: memref<4x256xbf16, #tpu.memory_space<vmem>>, %arg5: memref<1x256xf32, #tpu.memory_space<vmem>>, %arg6: memref<256x128xbf16, #tpu.memory_space<vmem>>, %arg7: memref<1x128xf32, #tpu.memory_space<vmem>>, %arg8: memref<1x128xbf16, #tpu.memory_space<vmem>>, %arg9: memref<1x1xf32, #tpu.memory_space<vmem>>, %arg10: memref<1x1x128xf32, #tpu.memory_space<vmem>>) attributes {dimension_semantics = [#tpu.dimension_semantics<parallel>], iteration_bounds = array<i64: 1>, scalar_prefetch = 0 : i64, scratch_operands = 0 : i64, tpu.core_type = #tpu.core_type<tc>, window_params = [{transform_indices = @transform_0, window_bounds = array<i64: 128, 16>}, {transform_indices = @transform_1, window_bounds = array<i64: 128, 4>}, {pipeline_mode = #tpu.pipeline_mode<synchronous>, transform_indices = @transform_2, window_bounds = array<i64: 16, 256>}, {pipeline_mode = #tpu.pipeline_mode<synchronous>, transform_indices = @transform_3, window_bounds = array<i64: 4, 256>}, {pipeline_mode = #tpu.pipeline_mode<synchronous>, transform_indices = @transform_4, window_bounds = array<i64: 1, 256>}, {pipeline_mode = #tpu.pipeline_mode<synchronous>, transform_indices = @transform_5, window_bounds = array<i64: 256, 128>}, {pipeline_mode = #tpu.pipeline_mode<synchronous>, transform_indices = @transform_6, window_bounds = array<i64: 1, 128>}, {pipeline_mode = #tpu.pipeline_mode<synchronous>, transform_indices = @transform_7, window_bounds = array<i64: 1, 128>}, {pipeline_mode = #tpu.pipeline_mode<synchronous>, transform_indices = @transform_8, window_bounds = array<i64: 1, 1>}, {transform_indices = @transform_9, window_bounds = array<i64: 1, 1, 128>}]} {
    %c0 = arith.constant 0 : index
    %c0_0 = arith.constant 0 : index
    %0 = vector.load %arg1[%c0, %c0_0] : memref<128x16xbf16, #tpu.memory_space<vmem>>, vector<128x16xbf16>
    %c0_1 = arith.constant 0 : index
    %c0_2 = arith.constant 0 : index
    %1 = vector.load %arg3[%c0_1, %c0_2] : memref<16x256xbf16, #tpu.memory_space<vmem>>, vector<16x256xbf16>
    %cst = arith.constant dense<0.000000e+00> : vector<128x256xf32>
    %2 = tpu.matmul %0, %1, %cst {dimension_numbers = #tpu.dot_dimension_numbers<[1], [0], [0], [1], [0, 0, 1, 1], [], []>} : vector<128x16xbf16>, vector<16x256xbf16>, vector<128x256xf32> -> vector<128x256xf32>
    %c0_3 = arith.constant 0 : index
    %c0_4 = arith.constant 0 : index
    %3 = vector.load %arg2[%c0_3, %c0_4] : memref<128x4xbf16, #tpu.memory_space<vmem>>, vector<128x4xbf16>
    %c0_5 = arith.constant 0 : index
    %c0_6 = arith.constant 0 : index
    %4 = vector.load %arg4[%c0_5, %c0_6] : memref<4x256xbf16, #tpu.memory_space<vmem>>, vector<4x256xbf16>
    %cst_7 = arith.constant dense<0.000000e+00> : vector<128x256xf32>
    %5 = tpu.matmul %3, %4, %cst_7 {dimension_numbers = #tpu.dot_dimension_numbers<[1], [0], [0], [1], [0, 0, 1, 1], [], []>} : vector<128x4xbf16>, vector<4x256xbf16>, vector<128x256xf32> -> vector<128x256xf32>
    %6 = arith.addf %2, %5 : vector<128x256xf32>
    %c0_8 = arith.constant 0 : index
    %c0_9 = arith.constant 0 : index
    %7 = vector.load %arg5[%c0_8, %c0_9] : memref<1x256xf32, #tpu.memory_space<vmem>>, vector<1x256xf32>
    %8 = vector.broadcast %7 : vector<1x256xf32> to vector<128x256xf32>
    %9 = arith.addf %6, %8 : vector<128x256xf32>
    %cst_10 = arith.constant 0.000000e+00 : f32
    %10 = vector.broadcast %cst_10 : f32 to vector<128x256xf32>
    %11 = arith.cmpf ogt, %9, %10 : vector<128x256xf32>
    %cst_11 = arith.constant 2.000000e-01 : f32
    %12 = vector.broadcast %cst_11 : f32 to vector<128x256xf32>
    %13 = arith.mulf %12, %9 : vector<128x256xf32>
    %14 = arith.select %11, %9, %13 : vector<128x256xi1>, vector<128x256xf32>
    %15 = arith.truncf %14 : vector<128x256xf32> to vector<128x256xbf16>
    %c0_12 = arith.constant 0 : index
    %c0_13 = arith.constant 0 : index
    %16 = vector.load %arg6[%c0_12, %c0_13] : memref<256x128xbf16, #tpu.memory_space<vmem>>, vector<256x128xbf16>
    %cst_14 = arith.constant dense<0.000000e+00> : vector<128x128xf32>
    %17 = tpu.matmul %15, %16, %cst_14 {dimension_numbers = #tpu.dot_dimension_numbers<[1], [0], [0], [1], [0, 0, 1, 1], [], []>} : vector<128x256xbf16>, vector<256x128xbf16>, vector<128x128xf32> -> vector<128x128xf32>
    %c0_15 = arith.constant 0 : index
    %c0_16 = arith.constant 0 : index
    %18 = vector.load %arg7[%c0_15, %c0_16] : memref<1x128xf32, #tpu.memory_space<vmem>>, vector<1x128xf32>
    %19 = vector.broadcast %18 : vector<1x128xf32> to vector<128x128xf32>
    %20 = arith.addf %17, %19 : vector<128x128xf32>
    %cst_17 = arith.constant 0.000000e+00 : f32
    %21 = vector.broadcast %cst_17 : f32 to vector<128x128xf32>
    %22 = arith.cmpf ogt, %20, %21 : vector<128x128xf32>
    %cst_18 = arith.constant 2.000000e-01 : f32
    %23 = vector.broadcast %cst_18 : f32 to vector<128x128xf32>
    %24 = arith.mulf %23, %20 : vector<128x128xf32>
    %25 = arith.select %22, %20, %24 : vector<128x128xi1>, vector<128x128xf32>
    %c0_19 = arith.constant 0 : index
    %c0_20 = arith.constant 0 : index
    %26 = vector.load %arg8[%c0_19, %c0_20] : memref<1x128xbf16, #tpu.memory_space<vmem>>, vector<1x128xbf16>
    %27 = arith.truncf %25 : vector<128x128xf32> to vector<128x128xbf16>
    %cst_21 = arith.constant dense<0.000000e+00> : vector<1x128xf32>
    %28 = tpu.matmul %26, %27, %cst_21 {dimension_numbers = #tpu.dot_dimension_numbers<[1], [1], [0], [0], [0, 0, 1, 0], [], []>} : vector<1x128xbf16>, vector<128x128xbf16>, vector<1x128xf32> -> vector<1x128xf32>
    %c0_22 = arith.constant 0 : index
    %c0_23 = arith.constant 0 : index
    %29 = vector.load %arg9[%c0_22, %c0_23] : memref<1x1xf32, #tpu.memory_space<vmem>>, vector<1x1xf32>
    %30 = vector.broadcast %29 : vector<1x1xf32> to vector<1x128xf32>
    %31 = arith.addf %28, %30 : vector<1x128xf32>
    %cst_24 = arith.constant 0.000000e+00 : f32
    %32 = vector.broadcast %cst_24 : f32 to vector<1x128xf32>
    %33 = arith.subf %32, %31 : vector<1x128xf32>
    %34 = math.exp %33 : vector<1x128xf32>
    %cst_25 = arith.constant 1.000000e+00 : f32
    %35 = vector.broadcast %cst_25 : f32 to vector<1x128xf32>
    %36 = arith.addf %35, %34 : vector<1x128xf32>
    %37 = tpu.reciprocal %36 {approx = true} : vector<1x128xf32> -> vector<1x128xf32>
    %38 = vector.shape_cast %37 : vector<1x128xf32> to vector<1x1x128xf32>
    %c0_26 = arith.constant 0 : index
    %c0_27 = arith.constant 0 : index
    %c0_28 = arith.constant 0 : index
    %39 = vector.load %arg10[%c0_26, %c0_27, %c0_28] : memref<1x1x128xf32, #tpu.memory_space<vmem>>, vector<1x1x128xf32>
    tpu.vector_store %arg10[%c0_26, %c0_27, %c0_28], %38 {strides = array<i32>} : memref<1x1x128xf32, #tpu.memory_space<vmem>>, vector<1x1x128xf32>,
    return
  }
  func.func @transform_0(%arg0: i32) -> (i32, i32) {
    %c0_i32 = arith.constant 0 : i32
    %c0_i32_0 = arith.constant 0 : i32
    return %arg0, %c0_i32 : i32, i32
  }
  func.func @transform_1(%arg0: i32) -> (i32, i32) {
    %c0_i32 = arith.constant 0 : i32
    %c0_i32_0 = arith.constant 0 : i32
    return %arg0, %c0_i32 : i32, i32
  }
  func.func @transform_2(%arg0: i32) -> (i32, i32) {
    %c0_i32 = arith.constant 0 : i32
    %c0_i32_0 = arith.constant 0 : i32
    %c0_i32_1 = arith.constant 0 : i32
    return %c0_i32, %c0_i32_0 : i32, i32
  }
  func.func @transform_3(%arg0: i32) -> (i32, i32) {
    %c0_i32 = arith.constant 0 : i32
    %c0_i32_0 = arith.constant 0 : i32
    %c0_i32_1 = arith.constant 0 : i32
    return %c0_i32, %c0_i32_0 : i32, i32
  }
  func.func @transform_4(%arg0: i32) -> (i32, i32) {
    %c0_i32 = arith.constant 0 : i32
    %c0_i32_0 = arith.constant 0 : i32
    %c0_i32_1 = arith.constant 0 : i32
    return %c0_i32, %c0_i32_0 : i32, i32
  }
  func.func @transform_5(%arg0: i32) -> (i32, i32) {
    %c0_i32 = arith.constant 0 : i32
    %c0_i32_0 = arith.constant 0 : i32
    %c0_i32_1 = arith.constant 0 : i32
    return %c0_i32, %c0_i32_0 : i32, i32
  }
  func.func @transform_6(%arg0: i32) -> (i32, i32) {
    %c0_i32 = arith.constant 0 : i32
    %c0_i32_0 = arith.constant 0 : i32
    %c0_i32_1 = arith.constant 0 : i32
    return %c0_i32, %c0_i32_0 : i32, i32
  }
  func.func @transform_7(%arg0: i32) -> (i32, i32) {
    %c0_i32 = arith.constant 0 : i32
    %c0_i32_0 = arith.constant 0 : i32
    %c0_i32_1 = arith.constant 0 : i32
    return %c0_i32, %c0_i32_0 : i32, i32
  }
  func.func @transform_8(%arg0: i32) -> (i32, i32) {
    %c0_i32 = arith.constant 0 : i32
    %c0_i32_0 = arith.constant 0 : i32
    %c0_i32_1 = arith.constant 0 : i32
    return %c0_i32, %c0_i32_0 : i32, i32
  }
  func.func @transform_9(%arg0: i32) -> (i32, i32, i32) {
    %c0_i32 = arith.constant 0 : i32
    %c0_i32_0 = arith.constant 0 : i32
    %c0_i32_1 = arith.constant 0 : i32
    return %arg0, %c0_i32, %c0_i32_0 : i32, i32, i32
  }
}

</mosaic_0001>

<bundles_post_ra>
// kernel: tpu_custom_call.1
= control target key start
LH: loop header
LB: loop body
LE: loop exit
PB: predicated region body
PF: predicated region fallthrough
CT: control target
= control target key end

     0   :  { %s1501_s0 = inlined_call_operand.vmem [shape: bf16[128,16], index: 0, kind: input, shape index: {}]   ;;  %s1502_s1 = inlined_call_operand.vmem [shape: bf16[128,4], index: 1, kind: input, shape index: {}]   ;;  %s1503_s2 = inlined_call_operand.vmem [shape: bf16[16,256], index: 2, kind: input, shape index: {}]   ;;  %s1504_s3 = inlined_call_operand.vmem [shape: bf16[4,256], index: 3, kind: input, shape index: {}]   ;;  %s1505_s4 = inlined_call_operand.vmem [shape: f32[1,256], index: 4, kind: input, shape index: {}]   ;;  %s1506_s5 = inlined_call_operand.vmem [shape: bf16[256,128], index: 5, kind: input, shape index: {}]   ;;  %s1507_s6 = inlined_call_operand.vmem [shape: f32[1,128], index: 6, kind: input, shape index: {}]   ;;  %s1508_s7 = inlined_call_operand.vmem [shape: bf16[1,128], index: 7, kind: input, shape index: {}]   ;;  %s1509_s8 = inlined_call_operand.<no memory space> [shape: f32[1,1], index: 8, kind: input, shape index: {}]   ;;  %s1510_s9 = inlined_call_operand.hbm [shape: f32[1,1,128], index: 9, kind: output, shape index: {}]  }
   0x1   :  { %v14_v0 = vstv %s1509_s8 }
   0x2   :  { %15 = vst [vmem:[#allocation2] sm:$0x1] %v14_v0 }
   0x3   :  { %v976_v1 = vld.sshfl [vmem:[%s1504_s3] sm:$0x33 pattern:$0x76325410]  ;;  %vm145_vm0 = vcmask 1041408   ;;  %v1214_v4 = vmov 0  }
   0x4   :  { %v119_v2 = vcombine.high %v976_v1, %v976_v1  ;;  %v147_v3 = vsel %vm145_vm0, %v976_v1, 0  ;;  %184 = vmatprep.mubr.bf16.mxu0 %v1214_v4  ;;  %1150 = vset.pattern.permute.xlu0 %v1214_v4  ;;  %v1151_v5 = vld [vmem:[%s1502_s1] sm:$0xff]   ;;  %vm120_vm1 = vcmask 31744   ;;  %v1155_v8 = vld [vmem:[%s1502_s1 + $0x8] sm:$0xff]   ;;  %v1156_v9 = vld [vmem:[%s1502_s1 + $0x10] sm:$0xff]  }
   0x5   :  { %v1154_v6 = vld [vmem:[%s1503_s2 + $0x4] ss:$8 sps:$4 sm:$0xff]   ;;  %v1152_v7 = vld [vmem:[%s1503_s2] ss:$8 sps:$4 sm:$0xff]   ;;  %v1174_v14 = vld [vmem:[%s1506_s5 + $0x50] sm:$0xff]  }
   0x6   :  { %977 = vmatprep.subr.msk.bf16.mxu0 %vm145_vm0, %v119_v2  ;;  %v1170_v10 = vld [vmem:[%s1506_s5 + $0x40] sm:$0xff]   ;;  %v1172_v12 = vld [vmem:[%s1506_s5 + $0x48] sm:$0xff]   ;;  %v1157_v15 = vld [vmem:[%s1502_s1 + $0x18] sm:$0xff]  }
   0x7   :  { %153 = vmatpush1.bf16.msra.mxu0 %v147_v3  ;;  %v1171_v11 = vld [vmem:[%s1506_s5] sm:$0xff]   ;;  %1021 = vmatprep.subr.bf16.mxu1 %v1170_v10  ;;  %v1173_v13 = vld [vmem:[%s1506_s5 + $0x8] sm:$0xff]   ;;  %v1175_v16 = vld [vmem:[%s1506_s5 + $0x10] sm:$0xff]  }
   0x8   :  { %340 = vmatprep.subr.bf16.mxu0 %v1154_v6  ;;  %1022 = vmatpush3.bf16.msra.mxu1 %v1171_v11  ;;  %v1176_v17 = vld [vmem:[%s1506_s5 + $0x58] sm:$0xff]   ;;  %v1178_v19 = vld [vmem:[%s1506_s5 + $0x60] sm:$0xff]  }
   0x9   :  { %1023 = vmatprep.subr.bf16.mxu1 %v1172_v12  ;;  %v1177_v18 = vld [vmem:[%s1506_s5 + $0x18] sm:$0xff]  }
   0xa   :  { %978 = vmatmul.mubr.msk.bf16.vlgmr.msra.gmra.mrb[0].mxu0 %vm120_vm1, %v1151_v5 }
   0xb   :  { %341 = vmatpush1.bf16.msra.mxu0 %v1152_v7  ;;  %194 = vmatprep.mubr.bf16.mxu0 %v1214_v4 }
   0xc   :  { %1024 = vmatpush3.bf16.msra.mxu1 %v1173_v13 }
   0xd   :  { %1025 = vmatprep.subr.bf16.mxu1 %v1174_v14 }
  0x10   :  { %1026 = vmatpush3.bf16.msra.mxu1 %v1175_v16 }
  0x11   :  { %1027 = vmatprep.subr.bf16.mxu1 %v1176_v17 }
  0x12   :  { %979 = vmatmul.mubr.msk.bf16.gmra.mrb[4].mxu0 %vm120_vm1, %v1155_v8 }
  0x13   :  { %204 = vmatprep.mubr.bf16.mxu0 %v1214_v4 }
  0x1a   :  { %980 = vmatmul.mubr.msk.bf16.gmra.mrb[8].mxu0 %vm120_vm1, %v1156_v9 }
  0x1b   :  { %214 = vmatprep.mubr.bf16.mxu0 %v1214_v4 }
  0x22   :  { %981 = vmatmul.mubr.msk.bf16.gmra.mrb[12].mxu0 %vm120_vm1, %v1157_v15 }
  0x23   :  { %224 = vmatprep.mubr.bf16.mxu0 %v1214_v4 }
  0x24   :  { %16 = vsyncpa [#allocation4], 0  ;;  %1028 = vmatpush3.bf16.msra.mxu1 %v1177_v18  ;;  %v1179_v20 = vld [vmem:[%s1506_s5 + $0x20] sm:$0xff]   ;;  %v1159_v22 = vld [vmem:[%s1502_s1 + $0x28] sm:$0xff]   ;;  %vm315_vm2 = vcmask 130048   ;;  %v455_v39 = vlaneseq  ;;  %s1217_s30 = smov [#allocation3]  }
  0x25   :  { %v1158_v21 = vld [vmem:[%s1502_s1 + $0x20] sm:$0xff]   ;;  %1029 = vmatprep.subr.bf16.mxu1 %v1178_v19  ;;  %v1160_v23 = vld [vmem:[%s1502_s1 + $0x30] sm:$0xff]   ;;  %v1161_v24 = vld [vmem:[%s1502_s1 + $0x38] sm:$0xff]   ;;  %s960_s10 = sshll.u32 %s1217_s30, 4  ;;  %s961_s10 = int_to_ptr.vmem [resolvable:$true] %s960_s10 }
  0x26   :  { %v1162_v25 = vld [vmem:[%s1501_s0] sm:$0xff]   ;;  %v1163_v26 = vld [vmem:[%s1501_s0 + $0x8] sm:$0xff]   ;;  %v1164_v27 = vld [vmem:[%s1501_s0 + $0x10] sm:$0xff]   ;;  %v1409_v40 = vshrl.u32 %v455_v39, 7  ;;  %s1194_s11 = scalar_lea.vmem %s961_s10, 32  ;;  %p1195_p1 = scmp.lt.s32.totalorder %s961_s10, %s961_s10 }
  0x27   :  { %v1165_v28 = vld [vmem:[%s1501_s0 + $0x18] sm:$0xff]   ;;  %v1166_v29 = vld [vmem:[%s1501_s0 + $0x20] sm:$0xff]   ;;  %v1167_v30 = vld [vmem:[%s1501_s0 + $0x28] sm:$0xff]  }
  0x28   :  { %1030 = vmatpush3.bf16.msra.mxu1 %v1179_v20  ;;  %v1168_v31 = vld [vmem:[%s1501_s0 + $0x30] sm:$0xff]   ;;  %v1169_v32 = vld [vmem:[%s1501_s0 + $0x38] sm:$0xff]   ;;  %v1180_v33 = vld [vmem:[%s1506_s5 + $0x68] sm:$0xff]   ;;  %v457_v41 = vsub.s32 0, %v1409_v40  ;;  %v461_v43 = vsub.s32 1, %v1409_v40 }
  0x29   :  { %v1181_v34 = vld [vmem:[%s1506_s5 + $0x28] sm:$0xff]   ;;  %1031 = vmatprep.subr.bf16.mxu1 %v1180_v33  ;;  %v1182_v35 = vld [vmem:[%s1506_s5 + $0x70] sm:$0xff]   ;;  %v1184_v37 = vld [vmem:[%s1506_s5 + $0x78] sm:$0xff]  }
  0x2a   :  { %982 = vmatmul.mubr.msk.bf16.gmra.mrb[16].mxu0 %vm120_vm1, %v1158_v21  ;;  %v1183_v36 = vld [vmem:[%s1506_s5 + $0x30] sm:$0xff]   ;;  %v1185_v38 = vld [vmem:[%s1506_s5 + $0x38] sm:$0xff]   ;;  %v453_v42 = vld [vmem:[%s1505_s4] sm:$0x3] }
  0x2b   :  { %234 = vmatprep.mubr.bf16.mxu0 %v1214_v4  ;;  %v1418_v44 = vrot.slane %v453_v42, %v457_v41  ;;  %v1420_v45 = vrot.slane %v453_v42, %v461_v43 }
  0x2c   :  { %1032 = vmatpush3.bf16.msra.mxu1 %v1181_v34 }
  0x2d   :  { %1033 = vmatprep.subr.bf16.mxu1 %v1182_v35 }
  0x30   :  { %1034 = vmatpush3.bf16.msra.mxu1 %v1183_v36 }
  0x31   :  { %1035 = vmatprep.subr.bf16.mxu1 %v1184_v37 }
  0x32   :  { %983 = vmatmul.mubr.msk.bf16.gmra.mrb[20].mxu0 %vm120_vm1, %v1159_v22 }
  0x33   :  { %244 = vmatprep.mubr.bf16.mxu0 %v1214_v4 }
  0x34   :  { %1036 = vmatpush3.bf16.msra.mxu1 %v1185_v38 }
  0x3a   :  { %984 = vmatmul.mubr.msk.bf16.gmra.mrb[24].mxu0 %vm120_vm1, %v1160_v23 }
  0x3b   :  { %254 = vmatprep.mubr.bf16.mxu0 %v1214_v4 }
  0x42   :  { %985 = vmatmul.mubr.msk.bf16.gmra.mrb[28].mxu0 %vm120_vm1, %v1161_v24 }
  0x43   :  { %372 = vmatprep.mubr.bf16.mxu0 %v1214_v4 }
  0x4a   :  { %996 = vmatmul.mubr.msk.bf16.vlgmr.msra.gmra.mrb[0].mxu0 %vm315_vm2, %v1162_v25 }
  0x4b   :  { %382 = vmatprep.mubr.bf16.mxu0 %v1214_v4 }
  0x52   :  { %997 = vmatmul.mubr.msk.bf16.gmra.mrb[4].mxu0 %vm315_vm2, %v1163_v26 }
  0x53   :  { %392 = vmatprep.mubr.bf16.mxu0 %v1214_v4 }
  0x5a   :  { %998 = vmatmul.mubr.msk.bf16.gmra.mrb[8].mxu0 %vm315_vm2, %v1164_v27 }
  0x5b   :  { %402 = vmatprep.mubr.bf16.mxu0 %v1214_v4 }
  0x62   :  { %999 = vmatmul.mubr.msk.bf16.gmra.mrb[12].mxu0 %vm315_vm2, %v1165_v28 }
  0x63   :  { %412 = vmatprep.mubr.bf16.mxu0 %v1214_v4 }
  0x6a   :  { %1000 = vmatmul.mubr.msk.bf16.gmra.mrb[16].mxu0 %vm315_vm2, %v1166_v29 }
  0x6b   :  { %422 = vmatprep.mubr.bf16.mxu0 %v1214_v4 }
  0x72   :  { %1001 = vmatmul.mubr.msk.bf16.gmra.mrb[20].mxu0 %vm315_vm2, %v1167_v30 }
  0x73   :  { %432 = vmatprep.mubr.bf16.mxu0 %v1214_v4 }
  0x7a   :  { %1002 = vmatmul.mubr.msk.bf16.gmra.mrb[24].mxu0 %vm315_vm2, %v1168_v31 }
  0x7b   :  { %442 = vmatprep.mubr.bf16.mxu0 %v1214_v4 }
  0x82   :  { %1003 = vmatmul.mubr.msk.bf16.gmra.mrb[28].mxu0 %vm315_vm2, %v1169_v32 }
 0x11d   :  { %v374_v46 = vpop.f32.mrb[0].mxu0 }
 0x11e   :  { %v465_v47 = vadd.f32 %v1418_v44, %v374_v46  ;;  %v376_v48 = vpop.f32.mrb[1].mxu0 }
 0x11f   :  { %v466_v49 = vadd.f32 %v1420_v45, %v376_v48  ;;  %v378_v50 = vpop.f32.mrb[2].mxu0 }
 0x120   :  { %v529_v51 = vmul.f32 0.2, %v465_v47  ;;  %v467_v52 = vadd.f32 %v1418_v44, %v378_v50  ;;  %v380_v53 = vpop.f32.mrb[3].mxu0  ;;  %vm497_vm3 = vcmp.gt.f32.partialorder %v465_v47, 0.0 }
 0x121   :  { %v530_v54 = vmul.f32 0.2, %v466_v49  ;;  %v468_v55 = vadd.f32 %v1420_v45, %v380_v53  ;;  %vm498_vm5 = vcmp.gt.f32.partialorder %v466_v49, 0.0 }
 0x122   :  { %vm499_vm4 = vcmp.gt.f32.partialorder %v467_v52, 0.0  ;;  %v531_v56 = vmul.f32 0.2, %v467_v52  ;;  %v561_v58 = vsel %vm497_vm3, %v465_v47, %v529_v51 }
 0x123   :  { %v532_v57 = vmul.f32 0.2, %v468_v55  ;;  %vm500_vm6 = vcmp.gt.f32.partialorder %v468_v55, 0.0  ;;  %v562_v61 = vsel %vm498_vm5, %v466_v49, %v530_v54 }
 0x124   :  { %v563_v59 = vsel %vm499_vm4, %v467_v52, %v531_v56 }
 0x125   :  { %v384_v60 = vpop.f32.mrb[4].mxu0  ;;  %v564_v62 = vsel %vm500_vm6, %v468_v55, %v532_v57  ;;  %v593_v63 = vpack.c.bf16 %v563_v59, %v561_v58 }
 0x126   :  { %v469_v0 = vadd.f32 %v1418_v44, %v384_v60  ;;  %v386_v1 = vpop.f32.mrb[5].mxu0  ;;  %v594_v2 = vpack.c.bf16 %v564_v62, %v562_v61 }
 0x127   :  { %v470_v3 = vadd.f32 %v1420_v45, %v386_v1  ;;  %v388_v4 = vpop.f32.mrb[6].mxu0 }
 0x128   :  { %v533_v5 = vmul.f32 0.2, %v469_v0  ;;  %v471_v6 = vadd.f32 %v1418_v44, %v388_v4  ;;  %v390_v7 = vpop.f32.mrb[7].mxu0  ;;  %776 = vmatprep.mubr.bf16.mxu1 %v594_v2  ;;  %vm501_vm7 = vcmp.gt.f32.partialorder %v469_v0, 0.0 }
 0x129   :  { %v534_v8 = vmul.f32 0.2, %v470_v3  ;;  %v472_v9 = vadd.f32 %v1420_v45, %v390_v7  ;;  %777 = vmatmul.mubr.bf16.vlgmr.msra.gmra.mrb[0].mxu1 %v593_v63  ;;  %vm502_vm8 = vcmp.gt.f32.partialorder %v470_v3, 0.0 }
 0x12a   :  { %vm503_vm9 = vcmp.gt.f32.partialorder %v471_v6, 0.0  ;;  %v535_v10 = vmul.f32 0.2, %v471_v6  ;;  %v565_v12 = vsel %vm501_vm7, %v469_v0, %v533_v5 }
 0x12b   :  { %vm504_vm10 = vcmp.gt.f32.partialorder %v472_v9, 0.0  ;;  %v536_v11 = vmul.f32 0.2, %v472_v9  ;;  %v566_v15 = vsel %vm502_vm8, %v470_v3, %v534_v8 }
 0x12c   :  { %v567_v13 = vsel %vm503_vm9, %v471_v6, %v535_v10 }
 0x12d   :  { %v394_v14 = vpop.f32.mrb[8].mxu0  ;;  %v568_v16 = vsel %vm504_vm10, %v472_v9, %v536_v11  ;;  %v595_v17 = vpack.c.bf16 %v567_v13, %v565_v12 }
 0x12e   :  { %v473_v18 = vadd.f32 %v1418_v44, %v394_v14  ;;  %v396_v19 = vpop.f32.mrb[9].mxu0  ;;  %v596_v20 = vpack.c.bf16 %v568_v16, %v566_v15 }
 0x12f   :  { %v474_v21 = vadd.f32 %v1420_v45, %v396_v19  ;;  %v398_v22 = vpop.f32.mrb[10].mxu0 }
 0x130   :  { %v537_v23 = vmul.f32 0.2, %v473_v18  ;;  %v475_v24 = vadd.f32 %v1418_v44, %v398_v22  ;;  %v400_v25 = vpop.f32.mrb[11].mxu0  ;;  %784 = vmatprep.mubr.bf16.mxu1 %v596_v20  ;;  %vm505_vm11 = vcmp.gt.f32.partialorder %v473_v18, 0.0 }
 0x131   :  { %v538_v26 = vmul.f32 0.2, %v474_v21  ;;  %v476_v27 = vadd.f32 %v1420_v45, %v400_v25  ;;  %785 = vmatmul.mubr.bf16.gmra.mrb[4].mxu1 %v595_v17  ;;  %vm506_vm12 = vcmp.gt.f32.partialorder %v474_v21, 0.0 }
 0x132   :  { %vm507_vm13 = vcmp.gt.f32.partialorder %v475_v24, 0.0  ;;  %v539_v28 = vmul.f32 0.2, %v475_v24  ;;  %v569_v30 = vsel %vm505_vm11, %v473_v18, %v537_v23 }
 0x133   :  { %vm508_vm14 = vcmp.gt.f32.partialorder %v476_v27, 0.0  ;;  %v540_v29 = vmul.f32 0.2, %v476_v27  ;;  %v570_v33 = vsel %vm506_vm12, %v474_v21, %v538_v26 }
 0x134   :  { %v571_v31 = vsel %vm507_vm13, %v475_v24, %v539_v28 }
 0x135   :  { %v404_v32 = vpop.f32.mrb[12].mxu0  ;;  %v572_v34 = vsel %vm508_vm14, %v476_v27, %v540_v29  ;;  %v597_v35 = vpack.c.bf16 %v571_v31, %v569_v30 }
 0x136   :  { %v477_v36 = vadd.f32 %v1418_v44, %v404_v32  ;;  %v406_v37 = vpop.f32.mrb[13].mxu0  ;;  %v598_v38 = vpack.c.bf16 %v572_v34, %v570_v33 }
 0x137   :  { %v478_v39 = vadd.f32 %v1420_v45, %v406_v37  ;;  %v408_v42 = vpop.f32.mrb[14].mxu0 }
 0x138   :  { %v541_v43 = vmul.f32 0.2, %v477_v36  ;;  %v479_v46 = vadd.f32 %v1418_v44, %v408_v42  ;;  %v410_v47 = vpop.f32.mrb[15].mxu0  ;;  %792 = vmatprep.mubr.bf16.mxu1 %v598_v38  ;;  %vm509_vm15 = vcmp.gt.f32.partialorder %v477_v36, 0.0 }
 0x139   :  { %v542_v48 = vmul.f32 0.2, %v478_v39  ;;  %v480_v49 = vadd.f32 %v1420_v45, %v410_v47  ;;  %793 = vmatmul.mubr.bf16.gmra.mrb[8].mxu1 %v597_v35  ;;  %vm510_vm0 = vcmp.gt.f32.partialorder %v478_v39, 0.0 }
 0x13a   :  { %vm511_vm1 = vcmp.gt.f32.partialorder %v479_v46, 0.0  ;;  %v543_v50 = vmul.f32 0.2, %v479_v46  ;;  %v573_v52 = vsel %vm509_vm15, %v477_v36, %v541_v43 }
 0x13b   :  { %vm512_vm2 = vcmp.gt.f32.partialorder %v480_v49, 0.0  ;;  %v544_v51 = vmul.f32 0.2, %v480_v49  ;;  %v574_v55 = vsel %vm510_vm0, %v478_v39, %v542_v48 }
 0x13c   :  { %v575_v53 = vsel %vm511_vm1, %v479_v46, %v543_v50 }
 0x13d   :  { %v414_v54 = vpop.f32.mrb[16].mxu0  ;;  %v576_v56 = vsel %vm512_vm2, %v480_v49, %v544_v51  ;;  %v599_v57 = vpack.c.bf16 %v575_v53, %v573_v52 }
 0x13e   :  { %v481_v58 = vadd.f32 %v1418_v44, %v414_v54  ;;  %v416_v59 = vpop.f32.mrb[17].mxu0  ;;  %v600_v60 = vpack.c.bf16 %v576_v56, %v574_v55 }
 0x13f   :  { %v482_v61 = vadd.f32 %v1420_v45, %v416_v59  ;;  %v418_v62 = vpop.f32.mrb[18].mxu0 }
 0x140   :  { %v545_v63 = vmul.f32 0.2, %v481_v58  ;;  %v483_v0 = vadd.f32 %v1418_v44, %v418_v62  ;;  %v420_v1 = vpop.f32.mrb[19].mxu0  ;;  %800 = vmatprep.mubr.bf16.mxu1 %v600_v60  ;;  %vm513_vm3 = vcmp.gt.f32.partialorder %v481_v58, 0.0 }
 0x141   :  { %v546_v2 = vmul.f32 0.2, %v482_v61  ;;  %v484_v3 = vadd.f32 %v1420_v45, %v420_v1  ;;  %801 = vmatmul.mubr.bf16.gmra.mrb[12].mxu1 %v599_v57  ;;  %vm514_vm4 = vcmp.gt.f32.partialorder %v482_v61, 0.0 }
 0x142   :  { %vm515_vm5 = vcmp.gt.f32.partialorder %v483_v0, 0.0  ;;  %v547_v4 = vmul.f32 0.2, %v483_v0  ;;  %v577_v6 = vsel %vm513_vm3, %v481_v58, %v545_v63  ;;  %vm1216_vm3 = vmmov 0  }
 0x143   :  { %vm516_vm6 = vcmp.gt.f32.partialorder %v484_v3, 0.0  ;;  %v548_v5 = vmul.f32 0.2, %v484_v3  ;;  %v578_v9 = vsel %vm514_vm4, %v482_v61, %v546_v2 }
 0x144   :  { %v579_v7 = vsel %vm515_vm5, %v483_v0, %v547_v4 }
 0x145   :  { %v424_v8 = vpop.f32.mrb[20].mxu0  ;;  %v580_v10 = vsel %vm516_vm6, %v484_v3, %v548_v5  ;;  %v601_v11 = vpack.c.bf16 %v579_v7, %v577_v6  ;;  %v1459_v7 = vld [vmem:[%s1507_s6] ss:$0 sm:$0xff] }
 0x146   :  { %v485_v12 = vadd.f32 %v1418_v44, %v424_v8  ;;  %v426_v13 = vpop.f32.mrb[21].mxu0  ;;  %v602_v14 = vpack.c.bf16 %v580_v10, %v578_v9 }
 0x147   :  { %v486_v15 = vadd.f32 %v1420_v45, %v426_v13  ;;  %v428_v16 = vpop.f32.mrb[22].mxu0 }
 0x148   :  { %v549_v17 = vmul.f32 0.2, %v485_v12  ;;  %v487_v18 = vadd.f32 %v1418_v44, %v428_v16  ;;  %v430_v19 = vpop.f32.mrb[23].mxu0  ;;  %808 = vmatprep.mubr.bf16.mxu1 %v602_v14  ;;  %vm517_vm7 = vcmp.gt.f32.partialorder %v485_v12, 0.0 }
 0x149   :  { %v550_v20 = vmul.f32 0.2, %v486_v15  ;;  %v488_v21 = vadd.f32 %v1420_v45, %v430_v19  ;;  %809 = vmatmul.mubr.bf16.gmra.mrb[16].mxu1 %v601_v11  ;;  %vm518_vm8 = vcmp.gt.f32.partialorder %v486_v15, 0.0 }
 0x14a   :  { %vm519_vm9 = vcmp.gt.f32.partialorder %v487_v18, 0.0  ;;  %v551_v22 = vmul.f32 0.2, %v487_v18  ;;  %v581_v24 = vsel %vm517_vm7, %v485_v12, %v549_v17 }
 0x14b   :  { %vm520_vm10 = vcmp.gt.f32.partialorder %v488_v21, 0.0  ;;  %v552_v23 = vmul.f32 0.2, %v488_v21  ;;  %v582_v27 = vsel %vm518_vm8, %v486_v15, %v550_v20 }
 0x14c   :  { %v583_v25 = vsel %vm519_vm9, %v487_v18, %v551_v22 }
 0x14d   :  { %v434_v26 = vpop.f32.mrb[24].mxu0  ;;  %v584_v28 = vsel %vm520_vm10, %v488_v21, %v552_v23  ;;  %v603_v29 = vpack.c.bf16 %v583_v25, %v581_v24 }
 0x14e   :  { %v489_v30 = vadd.f32 %v1418_v44, %v434_v26  ;;  %v436_v31 = vpop.f32.mrb[25].mxu0  ;;  %v604_v32 = vpack.c.bf16 %v584_v28, %v582_v27 }
 0x14f   :  { %v490_v33 = vadd.f32 %v1420_v45, %v436_v31  ;;  %v438_v34 = vpop.f32.mrb[26].mxu0 }
 0x150   :  { %v553_v35 = vmul.f32 0.2, %v489_v30  ;;  %v491_v36 = vadd.f32 %v1418_v44, %v438_v34  ;;  %v440_v37 = vpop.f32.mrb[27].mxu0  ;;  %816 = vmatprep.mubr.bf16.mxu1 %v604_v32  ;;  %vm521_vm11 = vcmp.gt.f32.partialorder %v489_v30, 0.0 }
 0x151   :  { %v554_v38 = vmul.f32 0.2, %v490_v33  ;;  %v492_v39 = vadd.f32 %v1420_v45, %v440_v37  ;;  %817 = vmatmul.mubr.bf16.gmra.mrb[20].mxu1 %v603_v29  ;;  %vm522_vm12 = vcmp.gt.f32.partialorder %v490_v33, 0.0 }
 0x152   :  { %vm523_vm13 = vcmp.gt.f32.partialorder %v491_v36, 0.0  ;;  %v555_v42 = vmul.f32 0.2, %v491_v36  ;;  %v585_v46 = vsel %vm521_vm11, %v489_v30, %v553_v35 }
 0x153   :  { %vm524_vm14 = vcmp.gt.f32.partialorder %v492_v39, 0.0  ;;  %v556_v43 = vmul.f32 0.2, %v492_v39  ;;  %v586_v49 = vsel %vm522_vm12, %v490_v33, %v554_v38 }
 0x154   :  { %v587_v47 = vsel %vm523_vm13, %v491_v36, %v555_v42 }
 0x155   :  { %v444_v48 = vpop.f32.mrb[28].mxu0  ;;  %v588_v50 = vsel %vm524_vm14, %v492_v39, %v556_v43  ;;  %v605_v51 = vpack.c.bf16 %v587_v47, %v585_v46 }
 0x156   :  { %v493_v52 = vadd.f32 %v1418_v44, %v444_v48  ;;  %v446_v53 = vpop.f32.mrb[29].mxu0  ;;  %v606_v54 = vpack.c.bf16 %v588_v50, %v586_v49 }
 0x157   :  { %v494_v55 = vadd.f32 %v1420_v45, %v446_v53  ;;  %v448_v56 = vpop.f32.mrb[30].mxu0 }
 0x158   :  { %v557_v57 = vmul.f32 0.2, %v493_v52  ;;  %v495_v58 = vadd.f32 %v1418_v44, %v448_v56  ;;  %v450_v59 = vpop.f32.mrb[31].mxu0  ;;  %824 = vmatprep.mubr.bf16.mxu1 %v606_v54  ;;  %vm525_vm15 = vcmp.gt.f32.partialorder %v493_v52, 0.0  ;;  %v1215_v44 = vmov 0.0  }
 0x159   :  { %v558_v60 = vmul.f32 0.2, %v494_v55  ;;  %v496_v61 = vadd.f32 %v1420_v45, %v450_v59  ;;  %825 = vmatmul.mubr.bf16.gmra.mrb[24].mxu1 %v605_v51  ;;  %vm526_vm0 = vcmp.gt.f32.partialorder %v494_v55, 0.0  ;;  %1094 = vmatprep.subr.bf16.mxu1 %v1215_v44  ;;  %v898_v45 = vld [vmem:[#allocation2] sm:$0x1] }
 0x15a   :  { %vm527_vm1 = vcmp.gt.f32.partialorder %v495_v58, 0.0  ;;  %v559_v62 = vmul.f32 0.2, %v495_v58  ;;  %v589_v0 = vsel %vm525_vm15, %v493_v52, %v557_v57  ;;  %901 = vperm.xlu0 %1150, %v898_v45  }
 0x15b   :  { %vm528_vm2 = vcmp.gt.f32.partialorder %v496_v61, 0.0  ;;  %v560_v63 = vmul.f32 0.2, %v496_v61  ;;  %v590_v2 = vsel %vm526_vm0, %v494_v55, %v558_v60 }
 0x15c   :  { %v591_v1 = vsel %vm527_vm1, %v495_v58, %v559_v62 }
 0x15d   :  { %v592_v3 = vsel %vm528_vm2, %v496_v61, %v560_v63  ;;  %v607_v4 = vpack.c.bf16 %v591_v1, %v589_v0 }
 0x15e   :  { %v608_v5 = vpack.c.bf16 %v592_v3, %v590_v2 }
 0x160   :  { %832 = vmatprep.mubr.bf16.mxu1 %v608_v5 }
 0x161   :  { %833 = vmatmul.mubr.bf16.gmra.mrb[28].mxu1 %v607_v4 }
 0x162   :  { %1110 = vmatprep.mubr.msk.bf16.mxu1 %vm1216_vm3, %v1215_v44 }
 0x1fc   :  { %v1037_v6 = vpop.f32.mrb[0].mxu1 }
 0x1fd   :  { %v1038_v8 = vpop.f32.mrb[1].mxu1 }
 0x1fe   :  { %v1039_v9 = vadd.f32 %v1038_v8, %v1037_v6  ;;  %v1040_v10 = vpop.f32.mrb[2].mxu1 }
 0x1ff   :  { %v1041_v11 = vpop.f32.mrb[3].mxu1 }
 0x200   :  { %v779_v12 = vadd.f32 %v1039_v9, %v1459_v7  ;;  %v1042_v13 = vadd.f32 %v1041_v11, %v1040_v10 }
 0x202   :  { %v857_v14 = vmul.f32 0.2, %v779_v12  ;;  %v782_v15 = vadd.f32 %v1042_v13, %v1459_v7  ;;  %vm841_vm4 = vcmp.gt.f32.partialorder %v779_v12, 0.0 }
 0x204   :  { %vm842_vm5 = vcmp.gt.f32.partialorder %v782_v15, 0.0  ;;  %v858_v16 = vmul.f32 0.2, %v782_v15  ;;  %v1043_v17 = vpop.f32.mrb[4].mxu1  ;;  %v873_v19 = vsel %vm841_vm4, %v779_v12, %v857_v14 }
 0x205   :  { %v1044_v18 = vpop.f32.mrb[5].mxu1 }
 0x206   :  { %v874_v20 = vsel %vm842_vm5, %v782_v15, %v858_v16  ;;  %v1045_v21 = vadd.f32 %v1044_v18, %v1043_v17  ;;  %v1046_v22 = vpop.f32.mrb[6].mxu1 }
 0x207   :  { %v1047_v23 = vpop.f32.mrb[7].mxu1  ;;  %v890_v24 = vpack.c.bf16 %v874_v20, %v873_v19 }
 0x208   :  { %v787_v25 = vadd.f32 %v1045_v21, %v1459_v7  ;;  %v1048_v26 = vadd.f32 %v1047_v23, %v1046_v22 }
 0x209   :  { %1095 = vmatpush3.bf16.xpose.msra.mxu1 %v890_v24 }
 0x20a   :  { %v859_v27 = vmul.f32 0.2, %v787_v25  ;;  %v790_v28 = vadd.f32 %v1048_v26, %v1459_v7  ;;  %1096 = vmatprep.subr.bf16.mxu1 %v1215_v44  ;;  %vm843_vm6 = vcmp.gt.f32.partialorder %v787_v25, 0.0 }
 0x20c   :  { %vm844_vm7 = vcmp.gt.f32.partialorder %v790_v28, 0.0  ;;  %v860_v29 = vmul.f32 0.2, %v790_v28  ;;  %v1049_v30 = vpop.f32.mrb[8].mxu1  ;;  %v875_v32 = vsel %vm843_vm6, %v787_v25, %v859_v27 }
 0x20d   :  { %v1050_v31 = vpop.f32.mrb[9].mxu1 }
 0x20e   :  { %v876_v33 = vsel %vm844_vm7, %v790_v28, %v860_v29  ;;  %v1051_v34 = vadd.f32 %v1050_v31, %v1049_v30  ;;  %v1052_v35 = vpop.f32.mrb[10].mxu1 }
 0x20f   :  { %v1053_v36 = vpop.f32.mrb[11].mxu1  ;;  %v891_v37 = vpack.c.bf16 %v876_v33, %v875_v32 }
 0x210   :  { %v795_v38 = vadd.f32 %v1051_v34, %v1459_v7  ;;  %v1054_v39 = vadd.f32 %v1053_v36, %v1052_v35 }
 0x211   :  { %1097 = vmatpush3.bf16.xpose.msra.mxu1 %v891_v37 }
 0x212   :  { %v861_v42 = vmul.f32 0.2, %v795_v38  ;;  %v798_v43 = vadd.f32 %v1054_v39, %v1459_v7  ;;  %1098 = vmatprep.subr.bf16.mxu1 %v1215_v44  ;;  %vm845_vm8 = vcmp.gt.f32.partialorder %v795_v38, 0.0 }
 0x214   :  { %vm846_vm9 = vcmp.gt.f32.partialorder %v798_v43, 0.0  ;;  %v862_v46 = vmul.f32 0.2, %v798_v43  ;;  %v1055_v47 = vpop.f32.mrb[12].mxu1  ;;  %v877_v49 = vsel %vm845_vm8, %v795_v38, %v861_v42 }
 0x215   :  { %v1056_v48 = vpop.f32.mrb[13].mxu1 }
 0x216   :  { %v878_v50 = vsel %vm846_vm9, %v798_v43, %v862_v46  ;;  %v1057_v51 = vadd.f32 %v1056_v48, %v1055_v47  ;;  %v1058_v52 = vpop.f32.mrb[14].mxu1 }
 0x217   :  { %v1059_v53 = vpop.f32.mrb[15].mxu1  ;;  %v892_v54 = vpack.c.bf16 %v878_v50, %v877_v49 }
 0x218   :  { %v803_v55 = vadd.f32 %v1057_v51, %v1459_v7  ;;  %v1060_v56 = vadd.f32 %v1059_v53, %v1058_v52 }
 0x219   :  { %1099 = vmatpush3.bf16.xpose.msra.mxu1 %v892_v54 }
 0x21a   :  { %v863_v57 = vmul.f32 0.2, %v803_v55  ;;  %v806_v58 = vadd.f32 %v1060_v56, %v1459_v7  ;;  %1100 = vmatprep.subr.bf16.mxu1 %v1215_v44  ;;  %vm847_vm10 = vcmp.gt.f32.partialorder %v803_v55, 0.0  ;;  %v902_v56 = vpop.permute.xlu0 %901 }
 0x21c   :  { %vm848_vm11 = vcmp.gt.f32.partialorder %v806_v58, 0.0  ;;  %v864_v59 = vmul.f32 0.2, %v806_v58  ;;  %v1061_v60 = vpop.f32.mrb[16].mxu1  ;;  %v879_v62 = vsel %vm847_vm10, %v803_v55, %v863_v57  ;;  %v889_v55 = vld [vmem:[%s1508_s7] sm:$0x1]  ;;  %v907_v57 = vrot.slane %v902_v56, %v457_v41 }
 0x21d   :  { %v1062_v61 = vpop.f32.mrb[17].mxu1  ;;  %s1190_s7 = scalar_lea.vmem %s961_s10, 16 }
 0x21e   :  { %v880_v63 = vsel %vm848_vm11, %v806_v58, %v864_v59  ;;  %v1063_v0 = vadd.f32 %v1062_v61, %v1061_v60  ;;  %v1064_v1 = vpop.f32.mrb[18].mxu1  ;;  %p1191_p0 = scmp.ne.s32.totalorder %s961_s10, %s1190_s7  ;;  %p1196_p2 = scmp.lt.s32.totalorder %s1194_s11, %s1190_s7 }
 0x21f   :  { %v1065_v2 = vpop.f32.mrb[19].mxu1  ;;  %v893_v3 = vpack.c.bf16 %v880_v63, %v879_v62 }
 0x220   :  { %v811_v4 = vadd.f32 %v1063_v0, %v1459_v7  ;;  %v1066_v5 = vadd.f32 %v1065_v2, %v1064_v1  ;;  %p1197_p3 = por %p1196_p2, %p1195_p1 }
 0x221   :  { %1101 = vmatpush3.bf16.xpose.msra.mxu1 %v893_v3 }
 0x222   :  { %v865_v45 = vmul.f32 0.2, %v811_v4  ;;  %v814_v6 = vadd.f32 %v1066_v5, %v1459_v7  ;;  %1102 = vmatprep.subr.bf16.mxu1 %v1215_v44  ;;  %vm849_vm12 = vcmp.gt.f32.partialorder %v811_v4, 0.0  ;;  %p1198_p4 = pnand %p1197_p3, %p1191_p0 }
 0x224   :  { %vm850_vm13 = vcmp.gt.f32.partialorder %v814_v6, 0.0  ;;  %v866_v8 = vmul.f32 0.2, %v814_v6  ;;  %v1067_v9 = vpop.f32.mrb[20].mxu1  ;;  %v881_v11 = vsel %vm849_vm12, %v811_v4, %v865_v45 }
 0x225   :  { %v1068_v10 = vpop.f32.mrb[21].mxu1 }
 0x226   :  { %v882_v12 = vsel %vm850_vm13, %v814_v6, %v866_v8  ;;  %v1069_v13 = vadd.f32 %v1068_v10, %v1067_v9  ;;  %v1070_v14 = vpop.f32.mrb[22].mxu1 }
 0x227   :  { %v1071_v15 = vpop.f32.mrb[23].mxu1  ;;  %v894_v16 = vpack.c.bf16 %v882_v12, %v881_v11 }
 0x228   :  { %v819_v17 = vadd.f32 %v1069_v13, %v1459_v7  ;;  %v1072_v18 = vadd.f32 %v1071_v15, %v1070_v14 }
 0x229   :  { %1103 = vmatpush3.bf16.xpose.msra.mxu1 %v894_v16 }
 0x22a   :  { %v867_v19 = vmul.f32 0.2, %v819_v17  ;;  %v822_v20 = vadd.f32 %v1072_v18, %v1459_v7  ;;  %1104 = vmatprep.subr.bf16.mxu1 %v1215_v44  ;;  %vm851_vm14 = vcmp.gt.f32.partialorder %v819_v17, 0.0 }
 0x22c   :  { %vm852_vm15 = vcmp.gt.f32.partialorder %v822_v20, 0.0  ;;  %v868_v21 = vmul.f32 0.2, %v822_v20  ;;  %v1073_v22 = vpop.f32.mrb[24].mxu1  ;;  %v883_v24 = vsel %vm851_vm14, %v819_v17, %v867_v19 }
 0x22d   :  { %v1074_v23 = vpop.f32.mrb[25].mxu1 }
 0x22e   :  { %v884_v25 = vsel %vm852_vm15, %v822_v20, %v868_v21  ;;  %v1075_v26 = vadd.f32 %v1074_v23, %v1073_v22  ;;  %v1076_v27 = vpop.f32.mrb[26].mxu1 }
 0x22f   :  { %v1077_v28 = vpop.f32.mrb[27].mxu1  ;;  %v895_v29 = vpack.c.bf16 %v884_v25, %v883_v24 }
 0x230   :  { %v827_v30 = vadd.f32 %v1075_v26, %v1459_v7  ;;  %v1078_v31 = vadd.f32 %v1077_v28, %v1076_v27 }
 0x231   :  { %1105 = vmatpush3.bf16.xpose.msra.mxu1 %v895_v29 }
 0x232   :  { %v869_v32 = vmul.f32 0.2, %v827_v30  ;;  %v830_v33 = vadd.f32 %v1078_v31, %v1459_v7  ;;  %1106 = vmatprep.subr.bf16.mxu1 %v1215_v44  ;;  %vm853_vm0 = vcmp.gt.f32.partialorder %v827_v30, 0.0 }
 0x234   :  { %vm854_vm1 = vcmp.gt.f32.partialorder %v830_v33, 0.0  ;;  %v870_v34 = vmul.f32 0.2, %v830_v33  ;;  %v1079_v35 = vpop.f32.mrb[28].mxu1  ;;  %v885_v37 = vsel %vm853_vm0, %v827_v30, %v869_v32 }
 0x235   :  { %v1080_v36 = vpop.f32.mrb[29].mxu1 }
 0x236   :  { %v886_v38 = vsel %vm854_vm1, %v830_v33, %v870_v34  ;;  %v1081_v39 = vadd.f32 %v1080_v36, %v1079_v35  ;;  %v1082_v42 = vpop.f32.mrb[30].mxu1 }
 0x237   :  { %v1083_v43 = vpop.f32.mrb[31].mxu1  ;;  %v896_v46 = vpack.c.bf16 %v886_v38, %v885_v37 }
 0x238   :  { %v835_v47 = vadd.f32 %v1081_v39, %v1459_v7  ;;  %v1084_v48 = vadd.f32 %v1083_v43, %v1082_v42 }
 0x239   :  { %1107 = vmatpush3.bf16.xpose.msra.mxu1 %v896_v46 }
 0x23a   :  { %v871_v49 = vmul.f32 0.2, %v835_v47  ;;  %v838_v50 = vadd.f32 %v1084_v48, %v1459_v7  ;;  %1108 = vmatprep.subr.bf16.mxu1 %v1215_v44  ;;  %vm855_vm2 = vcmp.gt.f32.partialorder %v835_v47, 0.0 }
 0x23c   :  { %vm856_vm3 = vcmp.gt.f32.partialorder %v838_v50, 0.0  ;;  %v872_v51 = vmul.f32 0.2, %v838_v50  ;;  %v887_v52 = vsel %vm855_vm2, %v835_v47, %v871_v49 }
 0x23e   :  { %v888_v53 = vsel %vm856_vm3, %v838_v50, %v872_v51 }
 0x23f   :  { %v897_v54 = vpack.c.bf16 %v888_v53, %v887_v52 }
 0x241   :  { %1109 = vmatpush3.bf16.xpose.msra.mxu1 %v897_v54 }
 0x248   :  { %1111 = vmatmul.mubr.bf16.vlgmr.msra.gmra.mrb[32].mxu1 %v889_v55 }
 0x31b   :  { %v942_v58 = vpop.f32.mrb[32].mxu1 }
 0x31c   :  { %v943_v7 = vadd.f32 %v942_v58, %v907_v57  ;;  %v1112_v59 = vpop.f32.mrb[33].mxu1 }
 0x31d   :  { %v945_v44 = vpop.f32.mrb[34].mxu1 }
 0x31e   :  { %v948_v60 = vsub.f32 0.0, %v943_v7  ;;  %v1113_v61 = vpop.f32.mrb[35].mxu1 }
 0x320   :  { %v949_v62 = vmul.f32 1.442695, %v948_v60 }
 0x322   :  { %1186 = vpow2.f32 %v949_v62 }
 0x32c   :  { %v1187_v63 = vpop.eup %1186 }
 0x32d   :  { %v951_v0 = vadd.f32 1.0, %v1187_v63 }
 0x32f   :  { %1188 = vrcp.f32 %v951_v0 }
 0x339   :  { %v1189_v1 = vpop.eup %1188 }
 0x33a   :  { %953 = vst [vmem:[#allocation3] sm:$0x1] %v1189_v1 }
 0x33b   :  { %1201 = shalt.err (!%p1198_p4)
}
 0x33c   :  { %s1202_s14 = scalar_lea.hbm %s1510_s9, 16 }
 0x33d   :  { %p1203_p5 = scmp.ne.s32.totalorder %s1510_s9, %s1202_s14  ;;  %p1206_p6 = scmp.lt.u32.totalorder %s1202_s14, %s1510_s9 }
 0x33f   :  { %p1208_p7 = pnand %p1206_p6, %p1203_p5 }
 0x341   :  { %1211 = shalt.err (!%p1208_p7)
}
 0x342   :  { %963 = dma.vmem_to_hbm [thread:$0]  %s961_s10, 16, %s1510_s9, [#allocation4]  }
 0x343   :  { %1212 = dma.done.wait [#allocation4], 16  }
 0x344   :  { %1213 = vsyncadd [#allocation4], 4294967280 }
 0x345   :  { %967 = vsyncpa [#allocation4], 1 }

</bundles_post_ra>
